<compile_context>
chip_gen: v7x
topology: tpu7x:2x2x1
jax: 0.10.0
libtpu: 0.0.40
codegen_flags: <defaults>
</compile_context>

<pallas_src>
import functools

import jax
import jax.numpy as jnp
from jax.experimental import pallas as pl
from jax.experimental.pallas import tpu as pltpu

LANES = 128          # lane (minor) dimension of every block
ACC_SUBLANES = 8     # small accumulator is one native (8, 128) f32 tile


def _detect_num_tensorcores():
    """Best-effort TensorCore count (2 on v7x-style chips, else 1). Never raises."""
    try:
        info = pltpu.get_tpu_info()
    except Exception:
        return 1
    for name in ("num_cores", "core_count", "num_tensorcores", "tensorcore_count",
                 "num_cores_per_chip", "cores_per_chip"):
        n = getattr(info, name, None)
        if isinstance(n, int) and 1 <= n <= 8:
            return n
    return 1


_NUM_TENSORCORES = _detect_num_tensorcores()


def _fused_kernel(a_ref, b_ref, c_ref, add_ref, cat_ref, dot_ref, acc_ref, *,
                  steps_per_core, num_tiles, tail_rows, need_clamp):
    step = pl.program_id(1)

    @pl.when(step == 0)
    def _init():
        acc_ref[...] = jnp.zeros_like(acc_ref)

    a = a_ref[...]
    b = b_ref[...]
    c = c_ref[...]

    max_1 = jnp.maximum(b, a)            # torch.max(args[1], args[0])
    add_ref[...] = max_1 + a             # torch.add(max_1, args[0])

    cat_ref[0] = c                       # torch.cat((args[2], args[2]), dim=0)
    cat_ref[1] = c

    max_2 = jnp.maximum(max_1, c).astype(jnp.float32)   # torch.max(max_1, args[2])
    mm = max_2 * max_2                   # per-element contribution to the dot product

    def accumulate(vals):
        # Pure VPU: fold (tile_rows, 128) into the resident (8, 128) accumulator.
        acc_ref[...] += vals.reshape(-1, ACC_SUBLANES, LANES).sum(axis=0)

    if need_clamp or tail_rows:
        tile = pl.program_id(0) * steps_per_core + step   # global tile index

    if tail_rows:
        is_ragged = tile == (num_tiles - 1)               # only the last tile is ragged
        full_ok = jnp.logical_not(is_ragged)
        if need_clamp:
            full_ok = jnp.logical_and(full_ok, tile < num_tiles)

        @pl.when(full_ok)
        def _full():                                      # steady state: no masking
            accumulate(mm)

        @pl.when(is_ragged)
        def _ragged():                                    # mask rows past the logical end
            row = jax.lax.broadcasted_iota(jnp.int32, mm.shape, 0)
            accumulate(jnp.where(row < tail_rows, mm, 0.0))
    elif need_clamp:
        @pl.when(tile < num_tiles)                        # skip clamped duplicate steps
        def _valid():
            accumulate(mm)
    else:
        accumulate(mm)

    @pl.when(step == pl.num_programs(1) - 1)
    def _finalize():
        dot_ref[0] = acc_ref[...]        # lane-dense (8,128) partial; reduced in wrapper


def _model1_forward(x0, x1, x2, *, tile_rows=2048, num_core_splits=None):
    """Pallas implementation of Model1.forward -> (add, cat, matmul)."""
    assert x0.shape == x1.shape == x2.shape, "inputs must share a shape"
    orig_shape = x0.shape
    out_dtype = jnp.result_type(x0.dtype, x1.dtype, x2.dtype)
    n = x0.size
    # TODO(synk): handle element counts not divisible by 128 (lane-tail masking).
    assert n % LANES == 0, "element count must be divisible by 128"
    rows = n // LANES

    # Row tile: multiple of 8 sublanes, capped by the (rounded-up) row count.
    tile_rows = max(ACC_SUBLANES, (int(tile_rows) // ACC_SUBLANES) * ACC_SUBLANES)
    tile_rows = min(tile_rows,
                    ((rows + ACC_SUBLANES - 1) // ACC_SUBLANES) * ACC_SUBLANES)
    num_tiles = -(-rows // tile_rows)          # cdiv
    tail_rows = rows % tile_rows               # 0 => last tile is full

    # Optional 2-way TensorCore split (only when >1 core detected / requested).
    splits = _NUM_TENSORCORES if num_core_splits is None else int(num_core_splits)
    splits = max(1, min(splits, 2, num_tiles))
    steps_per_core = -(-num_tiles // splits)   # cdiv
    need_clamp = splits * steps_per_core > num_tiles

    a2d = x0.reshape(rows, LANES).astype(out_dtype)
    b2d = x1.reshape(rows, LANES).astype(out_dtype)
    c2d = x2.reshape(rows, LANES).astype(out_dtype)

    if need_clamp:
        def row_block(c, i):
            return jnp.minimum(c * steps_per_core + i, num_tiles - 1)
    else:
        def row_block(c, i):
            return c * steps_per_core + i

    io_spec = pl.BlockSpec((tile_rows, LANES), lambda c, i: (row_block(c, i), 0))
    cat_spec = pl.BlockSpec((2, tile_rows, LANES),
                            lambda c, i: (0, row_block(c, i), 0))
    dot_spec = pl.BlockSpec((1, ACC_SUBLANES, LANES), lambda c, i: (c, 0, 0))

    # Dimension semantics: make the core split real on multi-TC chips.
    if splits > 1:
        core_par = getattr(pltpu, "CORE_PARALLEL", None)
        if core_par is not None and splits == _NUM_TENSORCORES:
            dim_sem = (core_par, pltpu.ARBITRARY)
        else:
            dim_sem = ("parallel", "arbitrary")
    else:
        dim_sem = ("arbitrary", "arbitrary")

    compiler_kwargs = dict(dimension_semantics=dim_sem)
    block_bytes = tile_rows * LANES * jnp.dtype(out_dtype).itemsize
    vmem_needed = 12 * block_bytes + (1 << 20)   # 6 live blocks x double buffer + slack
    if vmem_needed > (8 << 20):
        # Raise the scoped-VMEM limit for big tiles (v5e default is only 16 MiB);
        # 32 MiB is within physical VMEM on every supported generation.
        compiler_kwargs["vmem_limit_bytes"] = int(min(vmem_needed + (8 << 20), 32 << 20))

    kernel = functools.partial(
        _fused_kernel, steps_per_core=steps_per_core, num_tiles=num_tiles,
        tail_rows=tail_rows, need_clamp=need_clamp)

    add2d, cat3d, dot_part = pl.pallas_call(
        kernel,
        out_shape=(
            jax.ShapeDtypeStruct((rows, LANES), out_dtype),
            jax.ShapeDtypeStruct((2, rows, LANES), out_dtype),
            jax.ShapeDtypeStruct((splits, ACC_SUBLANES, LANES), jnp.float32),
        ),
        grid_spec=pltpu.PrefetchScalarGridSpec(
            num_scalar_prefetch=0,
            grid=(splits, steps_per_core),
            in_specs=[io_spec, io_spec, io_spec],
            out_specs=(io_spec, cat_spec, dot_spec),
            scratch_shapes=[pltpu.VMEM((ACC_SUBLANES, LANES), jnp.float32)],
        ),
        compiler_params=pltpu.CompilerParams(**compiler_kwargs),
    )(a2d, b2d, c2d)

    add = add2d.reshape(orig_shape)
    cat = cat3d.reshape((2 * orig_shape[0],) + tuple(orig_shape[1:]))
    matmul = jnp.sum(dot_part).astype(out_dtype)   # combine per-core partials -> scalar
    return add, cat, matmul


model1_forward = jax.jit(_model1_forward,
                         static_argnames=("tile_rows", "num_core_splits"))


if __name__ == "__main__":
    key = jax.random.PRNGKey(0)
    k0, k1, k2 = jax.random.split(key, 3)
    shape = (2, 4, 16, 16)   # 2048 elements = 16 rows x 128 lanes
    x0 = jax.random.normal(k0, shape, dtype=jnp.float32)
    x1 = jax.random.normal(k1, shape, dtype=jnp.float32)
    x2 = jax.random.normal(k2, shape, dtype=jnp.float32)

    # Reference in plain JAX (mirrors the PyTorch forward).
    max_1 = jnp.maximum(x1, x0)
    ref_add = max_1 + x0
    ref_cat = jnp.concatenate([x2, x2], axis=0)
    flat = jnp.maximum(max_1, x2).reshape(-1)
    ref_mm = jnp.dot(flat, flat)

    # 1) default config (single tile covers all 16 rows).
    add, cat, matmul = model1_forward(x0, x1, x2)
    (add, cat, matmul) = jax.block_until_ready((add, cat, matmul))
    assert add.shape == ref_add.shape, (add.shape, ref_add.shape)
    assert cat.shape == ref_cat.shape, (cat.shape, ref_cat.shape)
    assert jnp.allclose(add, ref_add, rtol=1e-5, atol=1e-5)
    assert jnp.allclose(cat, ref_cat, rtol=1e-5, atol=1e-5)
    assert jnp.allclose(matmul, ref_mm, rtol=1e-5, atol=1e-5), (matmul, ref_mm)

    # 2) force a multi-step grid (tile_rows=8 -> 2 full tiles) to exercise the
    #    accumulator across grid steps and the last-step finalize path.
    add2, cat2, mm2 = model1_forward(x0, x1, x2, tile_rows=8)
    (add2, cat2, mm2) = jax.block_until_ready((add2, cat2, mm2))
    assert jnp.allclose(add2, ref_add, rtol=1e-5, atol=1e-5)
    assert jnp.allclose(cat2, ref_cat, rtol=1e-5, atol=1e-5)
    assert jnp.allclose(mm2, ref_mm, rtol=1e-5, atol=1e-5), (mm2, ref_mm)

    print("KERNEL_OK")
</pallas_src>

<mosaic_0001>
module attributes {stable_mosaic.version = 11 : i64} {
  func.func @_fused_kernel(%arg0: i32, %arg1: i32, %arg2: memref<16x128xf32, #tpu.memory_space<vmem>>, %arg3: memref<16x128xf32, #tpu.memory_space<vmem>>, %arg4: memref<16x128xf32, #tpu.memory_space<vmem>>, %arg5: memref<16x128xf32, #tpu.memory_space<vmem>>, %arg6: memref<2x16x128xf32, #tpu.memory_space<vmem>>, %arg7: memref<1x8x128xf32, #tpu.memory_space<vmem>>, %arg8: memref<8x128xf32, #tpu.memory_space<vmem>>) attributes {dimension_semantics = [#tpu.dimension_semantics<arbitrary>, #tpu.dimension_semantics<arbitrary>], iteration_bounds = array<i64: 1, 1>, scalar_prefetch = 0 : i64, scratch_operands = 1 : i64, tpu.core_type = #tpu.core_type<tc>, window_params = [{transform_indices = @transform_0, window_bounds = array<i64: 16, 128>}, {transform_indices = @transform_1, window_bounds = array<i64: 16, 128>}, {transform_indices = @transform_2, window_bounds = array<i64: 16, 128>}, {transform_indices = @transform_3, window_bounds = array<i64: 16, 128>}, {transform_indices = @transform_4, window_bounds = array<i64: 2, 16, 128>}, {transform_indices = @transform_5, window_bounds = array<i64: 1, 8, 128>}]} {
    %c0_i32 = arith.constant 0 : i32
    %0 = arith.cmpi eq, %arg1, %c0_i32 : i32
    %1 = arith.extui %0 : i1 to i32
    %c0_i32_0 = arith.constant 0 : i32
    %2 = arith.cmpi ne, %1, %c0_i32_0 : i32
    scf.if %2 {
      %cst_19 = arith.constant 0.000000e+00 : f32
      %25 = vector.broadcast %cst_19 : f32 to vector<8x128xf32>
      %c0_20 = arith.constant 0 : index
      %c0_21 = arith.constant 0 : index
      %26 = vector.load %arg8[%c0_20, %c0_21] : memref<8x128xf32, #tpu.memory_space<vmem>>, vector<8x128xf32>
      tpu.vector_store %arg8[%c0_20, %c0_21], %25 {strides = array<i32>} : memref<8x128xf32, #tpu.memory_space<vmem>>, vector<8x128xf32>,
    } else {
    }
    %c0 = arith.constant 0 : index
    %c0_1 = arith.constant 0 : index
    %3 = vector.load %arg2[%c0, %c0_1] : memref<16x128xf32, #tpu.memory_space<vmem>>, vector<16x128xf32>
    %c0_2 = arith.constant 0 : index
    %c0_3 = arith.constant 0 : index
    %4 = vector.load %arg3[%c0_2, %c0_3] : memref<16x128xf32, #tpu.memory_space<vmem>>, vector<16x128xf32>
    %c0_4 = arith.constant 0 : index
    %c0_5 = arith.constant 0 : index
    %5 = vector.load %arg4[%c0_4, %c0_5] : memref<16x128xf32, #tpu.memory_space<vmem>>, vector<16x128xf32>
    %6 = arith.maximumf %4, %3 : vector<16x128xf32>
    %7 = arith.addf %6, %3 : vector<16x128xf32>
    %c0_6 = arith.constant 0 : index
    %c0_7 = arith.constant 0 : index
    %8 = vector.load %arg5[%c0_6, %c0_7] : memref<16x128xf32, #tpu.memory_space<vmem>>, vector<16x128xf32>
    tpu.vector_store %arg5[%c0_6, %c0_7], %7 {strides = array<i32>} : memref<16x128xf32, #tpu.memory_space<vmem>>, vector<16x128xf32>,
    %c0_8 = arith.constant 0 : index
    %c0_9 = arith.constant 0 : index
    %c0_10 = arith.constant 0 : index
    %9 = vector.load %arg6[%c0_8, %c0_9, %c0_10] : memref<2x16x128xf32, #tpu.memory_space<vmem>>, vector<1x16x128xf32>
    %10 = vector.shape_cast %9 : vector<1x16x128xf32> to vector<16x128xf32>
    %11 = vector.shape_cast %5 : vector<16x128xf32> to vector<1x16x128xf32>
    tpu.vector_store %arg6[%c0_8, %c0_9, %c0_10], %11 {strides = array<i32>} : memref<2x16x128xf32, #tpu.memory_space<vmem>>, vector<1x16x128xf32>,
    %c1 = arith.constant 1 : index
    %c0_11 = arith.constant 0 : index
    %c0_12 = arith.constant 0 : index
    %12 = vector.load %arg6[%c1, %c0_11, %c0_12] : memref<2x16x128xf32, #tpu.memory_space<vmem>>, vector<1x16x128xf32>
    %13 = vector.shape_cast %12 : vector<1x16x128xf32> to vector<16x128xf32>
    %14 = vector.shape_cast %5 : vector<16x128xf32> to vector<1x16x128xf32>
    tpu.vector_store %arg6[%c1, %c0_11, %c0_12], %14 {strides = array<i32>} : memref<2x16x128xf32, #tpu.memory_space<vmem>>, vector<1x16x128xf32>,
    %15 = arith.maximumf %6, %5 : vector<16x128xf32>
    %16 = arith.mulf %15, %15 : vector<16x128xf32>
    %c0_13 = arith.constant 0 : index
    %c0_14 = arith.constant 0 : index
    %17 = vector.load %arg8[%c0_13, %c0_14] : memref<8x128xf32, #tpu.memory_space<vmem>>, vector<8x128xf32>
    %18 = vector.shape_cast %16 : vector<16x128xf32> to vector<2x8x128xf32>
    %cst = arith.constant dense<0.000000e+00> : vector<8x128xf32>
    %19 = vector.multi_reduction <add>, %18, %cst [0] : vector<2x8x128xf32> to vector<8x128xf32>
    %20 = arith.addf %17, %19 : vector<8x128xf32>
    %c0_15 = arith.constant 0 : index
    %c0_16 = arith.constant 0 : index
    %21 = vector.load %arg8[%c0_15, %c0_16] : memref<8x128xf32, #tpu.memory_space<vmem>>, vector<8x128xf32>
    tpu.vector_store %arg8[%c0_15, %c0_16], %20 {strides = array<i32>} : memref<8x128xf32, #tpu.memory_space<vmem>>, vector<8x128xf32>,
    %c0_i32_17 = arith.constant 0 : i32
    %22 = arith.cmpi eq, %arg1, %c0_i32_17 : i32
    %23 = arith.extui %22 : i1 to i32
    %c0_i32_18 = arith.constant 0 : i32
    %24 = arith.cmpi ne, %23, %c0_i32_18 : i32
    scf.if %24 {
      %c0_19 = arith.constant 0 : index
      %c0_20 = arith.constant 0 : index
      %25 = vector.load %arg8[%c0_19, %c0_20] : memref<8x128xf32, #tpu.memory_space<vmem>>, vector<8x128xf32>
      %c0_21 = arith.constant 0 : index
      %c0_22 = arith.constant 0 : index
      %c0_23 = arith.constant 0 : index
      %26 = vector.load %arg7[%c0_21, %c0_22, %c0_23] : memref<1x8x128xf32, #tpu.memory_space<vmem>>, vector<1x8x128xf32>
      %27 = vector.shape_cast %26 : vector<1x8x128xf32> to vector<8x128xf32>
      %28 = vector.shape_cast %25 : vector<8x128xf32> to vector<1x8x128xf32>
      tpu.vector_store %arg7[%c0_21, %c0_22, %c0_23], %28 {strides = array<i32>} : memref<1x8x128xf32, #tpu.memory_space<vmem>>, vector<1x8x128xf32>,
    } else {
    }
    return
  }
  func.func @transform_0(%arg0: i32, %arg1: i32) -> (i32, i32) {
    %c1_i32 = arith.constant 1 : i32
    %0 = arith.muli %arg0, %c1_i32 : i32
    %1 = arith.addi %0, %arg1 : i32
    %c0_i32 = arith.constant 0 : i32
    %c0_i32_0 = arith.constant 0 : i32
    return %1, %c0_i32 : i32, i32
  }
  func.func @transform_1(%arg0: i32, %arg1: i32) -> (i32, i32) {
    %c1_i32 = arith.constant 1 : i32
    %0 = arith.muli %arg0, %c1_i32 : i32
    %1 = arith.addi %0, %arg1 : i32
    %c0_i32 = arith.constant 0 : i32
    %c0_i32_0 = arith.constant 0 : i32
    return %1, %c0_i32 : i32, i32
  }
  func.func @transform_2(%arg0: i32, %arg1: i32) -> (i32, i32) {
    %c1_i32 = arith.constant 1 : i32
    %0 = arith.muli %arg0, %c1_i32 : i32
    %1 = arith.addi %0, %arg1 : i32
    %c0_i32 = arith.constant 0 : i32
    %c0_i32_0 = arith.constant 0 : i32
    return %1, %c0_i32 : i32, i32
  }
  func.func @transform_3(%arg0: i32, %arg1: i32) -> (i32, i32) {
    %c1_i32 = arith.constant 1 : i32
    %0 = arith.muli %arg0, %c1_i32 : i32
    %1 = arith.addi %0, %arg1 : i32
    %c0_i32 = arith.constant 0 : i32
    %c0_i32_0 = arith.constant 0 : i32
    return %1, %c0_i32 : i32, i32
  }
  func.func @transform_4(%arg0: i32, %arg1: i32) -> (i32, i32, i32) {
    %c1_i32 = arith.constant 1 : i32
    %0 = arith.muli %arg0, %c1_i32 : i32
    %1 = arith.addi %0, %arg1 : i32
    %c0_i32 = arith.constant 0 : i32
    %c0_i32_0 = arith.constant 0 : i32
    %c0_i32_1 = arith.constant 0 : i32
    return %c0_i32, %1, %c0_i32_0 : i32, i32, i32
  }
  func.func @transform_5(%arg0: i32, %arg1: i32) -> (i32, i32, i32) {
    %c0_i32 = arith.constant 0 : i32
    %c0_i32_0 = arith.constant 0 : i32
    %c0_i32_1 = arith.constant 0 : i32
    return %arg0, %c0_i32, %c0_i32_0 : i32, i32, i32
  }
}

</mosaic_0001>

<bundles_post_ra>
// kernel: _model1_forward.1
= control target key start
LH: loop header
LB: loop body
LE: loop exit
PB: predicated region body
PF: predicated region fallthrough
CT: control target
= control target key end

     0   :  { %s291_s0 = inlined_call_operand.vmem [shape: f32[16,128], index: 0, kind: input, shape index: {}]   ;;  %s292_s1 = inlined_call_operand.vmem [shape: f32[16,128], index: 1, kind: input, shape index: {}]   ;;  %s293_s2 = inlined_call_operand.vmem [shape: f32[16,128], index: 2, kind: input, shape index: {}]   ;;  %s294_s4 = inlined_call_operand.vmem [shape: f32[2,16,128], index: 4, kind: output, shape index: {1}]   ;;  %s295_s3 = inlined_call_operand.vmem [shape: f32[16,128], index: 3, kind: output, shape index: {0}]   ;;  %s296_s5 = inlined_call_operand.vmem [shape: f32[1,8,128], index: 5, kind: output, shape index: {2}]  }
   0x1   :  { %v116_v0 = vld [vmem:[%s291_s0] sm:$0xff]  ;;  %v117_v2 = vld [vmem:[%s291_s0 + $0x8] sm:$0xff] }
   0x2   :  { %v118_v1 = vld [vmem:[%s292_s1] sm:$0xff]  ;;  %v119_v4 = vld [vmem:[%s292_s1 + $0x8] sm:$0xff] }
   0x3   :  { %v122_v3 = vmax.f32 %v118_v1, %v116_v0  ;;  %v120_v5 = vld [vmem:[%s293_s2] sm:$0xff]  ;;  %v121_v6 = vld [vmem:[%s293_s2 + $0x8] sm:$0xff]  ;;  %v123_v7 = vmax.f32 %v119_v4, %v117_v2 }
   0x4   :  { %128 = vst [vmem:[%s294_s4] sm:$0xff] %v120_v5  ;;  %220 = vst [vmem:[%s294_s4 + $0x10] sm:$0xff] %v120_v5 }
   0x5   :  { %129 = vst [vmem:[%s294_s4 + $0x8] sm:$0xff] %v121_v6  ;;  %221 = vst [vmem:[%s294_s4 + $0x18] sm:$0xff] %v121_v6  ;;  %v124_v8 = vadd.f32 %v122_v3, %v116_v0  ;;  %v133_v9 = vmax.f32 %v122_v3, %v120_v5  ;;  %v125_v10 = vadd.f32 %v123_v7, %v117_v2 }
   0x6   :  { %v134_v11 = vmax.f32 %v123_v7, %v121_v6 }
   0x7   :  { %126 = vst [vmem:[%s295_s3] sm:$0xff] %v124_v8  ;;  %v135_v12 = vmul.f32 %v133_v9, %v133_v9  ;;  %127 = vst [vmem:[%s295_s3 + $0x8] sm:$0xff] %v125_v10 }
   0x8   :  { %v136_v13 = vmul.f32 %v134_v11, %v134_v11 }
   0xa   :  { %v138_v14 = vadd.f32 %v136_v13, %v135_v12 }
   0xc   :  { %145 = vst [vmem:[%s296_s5] sm:$0xff] %v138_v14 }

</bundles_post_ra>
